<compile_context>
chip_gen: v7x
topology: tpu7x:2x2x1
jax: 0.10.0
libtpu: 0.0.40
codegen_flags: <defaults>
</compile_context>

<pallas_src>
import jax
import jax.numpy as jnp
from jax.experimental import pallas as pl
from jax.experimental.pallas import tpu as pltpu


def _nary_tree_lstm_kernel(
    idd_ref, idrl_ref, x_ref, h0_ref, c0_ref, wx_ref, bx_ref, wh_ref,   # inputs
    h_out_ref, c_out_ref,                                               # outputs
    ioux_scr, vg_scr, vrl_scr, h_scr, c_scr,                            # VMEM scratch
):
    f32 = jnp.float32
    lvl = pl.program_id(0)
    n_lvl = pl.num_programs(0)

    B, S, E = x_ref.shape
    H = h0_ref.shape[-1]
    H3, H4 = 3 * H, 4 * H

    # ---- Level-invariant work: done once at level 0, kept VMEM-resident for all levels ----
    @pl.when(lvl == 0)
    def _init():
        x2 = x_ref[...].reshape(B * S, E)
        # ONE x-side matmul: [ioux(x) | fx(x)] with a single hoisted bias add (128-lane output).
        xw = (jnp.dot(x2, wx_ref[...], preferred_element_type=f32)
              + bx_ref[...]).reshape(B, S, H4)
        ioux_scr[...] = xw[..., :H3]          # ioux(x) + b
        vg_scr[:, 0:S, :] = xw[..., H3:]      # fx(x) + b   -> rows 0..S-1 of the gather stack
        h_scr[...] = h0_ref[...]              # running state lives in VMEM across levels
        c_scr[...] = c0_ref[...]

    idd = idd_ref[...]                        # (B, S)   tree_ids_d
    idrl = idrl_ref[...]                      # (B, 2S)  [tree_ids_dr | tree_ids_dl]
    idr = idrl[:, 0:S]
    idl = idrl[:, S:]

    h = h_scr[...]
    c_prev = c_scr[...]

    # ---- ONE h-side matmul per level.  W_h is packed [iouh_r | fh_r | iouh_l | fh_l] so the
    #      128-lane vreg boundary of the (B*S, 8H) result splits the r / l halves exactly.
    hw = jnp.dot(h.reshape(B * S, H), wh_ref[...],
                 preferred_element_type=f32).reshape(B, S, 8 * H)
    vrl_scr[:, 0:S, :] = hw[..., 0:H3]            # iouh_r(h)
    vrl_scr[:, S:, :] = hw[..., H4:H4 + H3]       # iouh_l(h)
    vg_scr[:, S:2 * S, :] = hw[..., H3:H4]        # (fh0+fh1)(h)
    vg_scr[:, 2 * S:, :] = hw[..., H4 + H3:]      # (fh2+fh3)(h)

    # ---- merged scatter_add of iouh_r@index_r and iouh_l@index_l: ONE K=2S batched matmul ----
    # MrlT[b, t, j] = 1 iff idrl[b, j] == t  (columns j<S: right child, j>=S: left child)
    t_row = jax.lax.broadcasted_iota(jnp.int32, (B, S, 2 * S), 1)
    MrlT = (idrl[:, None, :] == t_row).astype(f32)                      # (B, T, 2S)
    iou = ioux_scr[...] + jnp.einsum('btj,bjo->bto', MrlT, vrl_scr[...],
                                     preferred_element_type=f32)

    i_g = jax.nn.sigmoid(iou[..., 0:H])
    o_g = jax.nn.sigmoid(iou[..., H:2 * H])
    u_g = jnp.tanh(iou[..., 2 * H:])

    # ---- merged forget-gate gather (index, index_r, index_l): ONE K=3S batched matmul ----
    # Mg rows have exactly one 1 in each of the three column blocks [idd | S+idr | 2S+idl].
    col = jax.lax.broadcasted_iota(jnp.int32, (B, S, 3 * S), 2)
    Mg = ((col == idd[:, :, None])
          | (col == idr[:, :, None] + S)
          | (col == idl[:, :, None] + 2 * S)).astype(f32)               # (B, S, 3S)
    f = jax.nn.sigmoid(jnp.einsum('bsj,bjh->bsh', Mg, vg_scr[...],
                                  preferred_element_type=f32))

    # ---- c/h update: scatter_add of f*c_prev at index (duplicate indices sum) ----
    t_mid = jax.lax.broadcasted_iota(jnp.int32, (B, S, S), 1)
    MdT = (idd[:, None, :] == t_mid).astype(f32)                        # (B, T, S)
    fc = f * c_prev
    c_new = i_g * u_g + jnp.einsum('bts,bsh->bth', MdT, fc, preferred_element_type=f32)
    h_new = o_g * jnp.tanh(c_new)

    # updated_nodes: scatter destinations of `index`, excluding position 0.
    counts = jnp.sum(MdT, axis=2)                                       # (B, S)
    dst = jax.lax.broadcasted_iota(jnp.int32, (B, S), 1)
    updated = jnp.logical_and(counts > 0.0, dst > 0)[:, :, None]

    h_next = jnp.where(updated, h_new, h)
    c_next = jnp.where(updated, c_new, c_prev)
    h_scr[...] = h_next
    c_scr[...] = c_next

    # ---- final level: write the VMEM-resident state back to HBM once ----
    @pl.when(lvl == n_lvl - 1)
    def _finalize():
        h_out_ref[...] = h_next
        c_out_ref[...] = c_next


@jax.jit
def nary_tree_lstm_levels(x, h0, c0, tree_ids_d, tree_ids_dr, tree_ids_dl, W_x, b_x, W_h):
    """Apply the Tree-LSTM cell over all tree levels in ONE pallas_call.

    tree_ids_* have shape (L, B, S): one (B, S) index set per level.  With L == 1 this is exactly
    the original module forward.  x / weights are level-invariant (as in the parent model's loop).
    """
    L, B, S = tree_ids_d.shape
    E = x.shape[-1]
    H = h0.shape[-1]
    # Pre-concatenated [index_r | index_l] so the kernel builds ONE merged scatter one-hot.
    ids_rl = jnp.concatenate([tree_ids_dr, tree_ids_dl], axis=-1)       # (L, B, 2S)

    grid_spec = pltpu.PrefetchScalarGridSpec(
        num_scalar_prefetch=0,
        grid=(L,),
        in_specs=[
            pl.BlockSpec((None, B, S), lambda l: (l, 0, 0)),        # tree_ids_d, level l
            pl.BlockSpec((None, B, 2 * S), lambda l: (l, 0, 0)),    # [ids_r | ids_l], level l
            pl.BlockSpec((B, S, E), lambda l: (0, 0, 0)),           # x        (DMA'd once)
            pl.BlockSpec((B, S, H), lambda l: (0, 0, 0)),           # h0       (DMA'd once)
            pl.BlockSpec((B, S, H), lambda l: (0, 0, 0)),           # c0       (DMA'd once)
            pl.BlockSpec((E, 4 * H), lambda l: (0, 0)),             # W_x      (DMA'd once)
            pl.BlockSpec((1, 4 * H), lambda l: (0, 0)),             # b_x      (DMA'd once)
            pl.BlockSpec((H, 8 * H), lambda l: (0, 0)),             # W_h      (DMA'd once)
        ],
        out_specs=[
            pl.BlockSpec((B, S, H), lambda l: (0, 0, 0)),           # h (written at last level)
            pl.BlockSpec((B, S, H), lambda l: (0, 0, 0)),           # c (written at last level)
        ],
        scratch_shapes=[
            pltpu.VMEM((B, S, 3 * H), jnp.float32),      # ioux(x)+b          (level-invariant)
            pltpu.VMEM((B, 3 * S, H), jnp.float32),      # gather stack  [fx(x); fh_r(h); fh_l(h)]
            pltpu.VMEM((B, 2 * S, 3 * H), jnp.float32),  # scatter stack [iouh_r(h); iouh_l(h)]
            pltpu.VMEM((B, S, H), jnp.float32),          # running h
            pltpu.VMEM((B, S, H), jnp.float32),          # running c
        ],
    )
    # NOTE: for production sizes add a batch/tree grid axis marked "parallel" (2 TCs on v7x) and
    # re-derive the VMEM budget against 64 MiB there; footprint here is ~100 KB.
    return pl.pallas_call(
        _nary_tree_lstm_kernel,
        out_shape=(jax.ShapeDtypeStruct((B, S, H), jnp.float32),
                   jax.ShapeDtypeStruct((B, S, H), jnp.float32)),
        grid_spec=grid_spec,
        compiler_params=pltpu.CompilerParams(
            dimension_semantics=("arbitrary",),          # level axis carries h/c state
            vmem_limit_bytes=32 * 1024 * 1024,
        ),
    )(tree_ids_d, ids_rl, x, h0, c0, W_x, b_x, W_h)


def nary_tree_lstm_cell(x, hx, tree_ids_d, tree_ids_dr, tree_ids_dl, W_x, b_x, W_h):
    """Single-level forward matching the PyTorch module signature (hx = (h, c))."""
    h, c = hx
    return nary_tree_lstm_levels(x, h, c, tree_ids_d[None], tree_ids_dr[None],
                                 tree_ids_dl[None], W_x, b_x, W_h)


def init_params(key, embedding_size, hidden_size):
    ks = jax.random.split(key, 10)

    def lin(k, fan_in, fan_out):
        bound = float(fan_in) ** -0.5
        return jax.random.uniform(k, (fan_in, fan_out), jnp.float32, -bound, bound)

    return {
        'Wioux': lin(ks[0], embedding_size, 3 * hidden_size),
        'bioux': jax.random.uniform(ks[1], (1, 3 * hidden_size), jnp.float32, -0.1, 0.1),
        'Wiouh_r': lin(ks[2], hidden_size, 3 * hidden_size),   # iouh[0]
        'Wiouh_l': lin(ks[3], hidden_size, 3 * hidden_size),   # iouh[1]
        'Wfx': lin(ks[4], embedding_size, hidden_size),
        'bfx': jax.random.uniform(ks[5], (1, hidden_size), jnp.float32, -0.1, 0.1),
        'Wfh0': lin(ks[6], hidden_size, hidden_size),
        'Wfh1': lin(ks[7], hidden_size, hidden_size),
        'Wfh2': lin(ks[8], hidden_size, hidden_size),
        'Wfh3': lin(ks[9], hidden_size, hidden_size),
    }


def fuse_params(params):
    """One-time algebraic weight folding/fusion (outside the kernel).

    - Forget-gate weights gathered at the same index sum exactly: fh0+fh1 (idx_r), fh2+fh3 (idx_l).
    - x-side weights -> one (E, 4H) matmul; h-side weights -> one (H, 8H) matmul whose column
      order [iouh_r | fh_r | iouh_l | fh_l] puts the 128-lane vreg boundary between r/l halves.
    """
    W_x = jnp.concatenate([params['Wioux'], params['Wfx']], axis=1)                 # (E, 4H)
    b_x = jnp.concatenate([params['bioux'], params['bfx']], axis=1)                 # (1, 4H)
    W_h = jnp.concatenate([params['Wiouh_r'], params['Wfh0'] + params['Wfh1'],
                           params['Wiouh_l'], params['Wfh2'] + params['Wfh3']],
                          axis=1)                                                   # (H, 8H)
    return W_x, b_x, W_h


def ref_forward(x, h, c, idd, idr, idl, params):
    # Pure-JAX reference mirroring the PyTorch semantics (scatter_add / gather), unfused weights.
    B, S, _ = x.shape
    brow = jnp.arange(B)[:, None]

    def scatter_add(dest, idx, src):
        return dest.at[brow, idx, :].add(src)

    def gather(src, idx):
        idx3 = jnp.broadcast_to(idx[:, :, None], (B, S, src.shape[-1]))
        return jnp.take_along_axis(src, idx3, axis=1)

    iou = x @ params['Wioux'] + params['bioux']
    iou = scatter_add(iou, idr, h @ params['Wiouh_r'])
    iou = scatter_add(iou, idl, h @ params['Wiouh_l'])
    i, o, u = jnp.split(iou, 3, axis=-1)
    i, o, u = jax.nn.sigmoid(i), jax.nn.sigmoid(o), jnp.tanh(u)

    fxv = x @ params['Wfx'] + params['bfx']
    f = (gather(fxv, idd)
         + gather(h @ params['Wfh0'], idr) + gather(h @ params['Wfh1'], idr)
         + gather(h @ params['Wfh2'], idl) + gather(h @ params['Wfh3'], idl))
    f = jax.nn.sigmoid(f)

    fc = f * c
    cn = i * u
    cn = scatter_add(cn, idd, fc)
    hn = o * jnp.tanh(cn)

    counts = jnp.zeros((B, S), jnp.int32).at[brow, idd].add(1)
    counts = counts.at[:, 0].set(0)
    updated = (counts > 0)[:, :, None]
    hn = jnp.where(updated, hn, h)
    cn = jnp.where(updated, cn, c)
    return hn, cn


if __name__ == "__main__":
    B, S, E, H = 2, 8, 32, 32      # config.N = 2, embedding_size = 32, hidden_size = 32
    L = 4                          # tree depth (number of cell applications fused in one call)
    key = jax.random.PRNGKey(0)
    k_x, k_h, k_c, k_d, k_r, k_l, k_p = jax.random.split(key, 7)

    x = jax.random.normal(k_x, (B, S, E), jnp.float32)
    h0 = jax.random.normal(k_h, (B, S, H), jnp.float32)
    c0 = jax.random.normal(k_c, (B, S, H), jnp.float32)
    ids_d = jax.random.randint(k_d, (L, B, S), 0, S, jnp.int32)
    ids_r = jax.random.randint(k_r, (L, B, S), 0, S, jnp.int32)
    ids_l = jax.random.randint(k_l, (L, B, S), 0, S, jnp.int32)
    params = init_params(k_p, E, H)
    W_x, b_x, W_h = fuse_params(params)     # one-time weight folding / fusion

    # Fused multi-level call: one pallas_call, VMEM-resident h/c/weights across all levels.
    h_out, c_out = jax.block_until_ready(
        nary_tree_lstm_levels(x, h0, c0, ids_d, ids_r, ids_l, W_x, b_x, W_h))

    # Reference: iterate the unfused single-level reference over the levels.
    h_ref, c_ref = h0, c0
    for lvl in range(L):
        h_ref, c_ref = ref_forward(x, h_ref, c_ref, ids_d[lvl], ids_r[lvl], ids_l[lvl], params)
    assert jnp.allclose(h_out, h_ref, atol=2e-3, rtol=2e-3), "multi-level h mismatch"
    assert jnp.allclose(c_out, c_ref, atol=2e-3, rtol=2e-3), "multi-level c mismatch"

    # Single-level call == the original module's forward semantics.
    h1, c1 = jax.block_until_ready(
        nary_tree_lstm_cell(x, (h0, c0), ids_d[0], ids_r[0], ids_l[0], W_x, b_x, W_h))
    h1_ref, c1_ref = ref_forward(x, h0, c0, ids_d[0], ids_r[0], ids_l[0], params)
    assert jnp.allclose(h1, h1_ref, atol=2e-3, rtol=2e-3), "single-level h mismatch"
    assert jnp.allclose(c1, c1_ref, atol=2e-3, rtol=2e-3), "single-level c mismatch"

    print("KERNEL_OK")
</pallas_src>

<mosaic_0001>
module attributes {stable_mosaic.version = 11 : i64} {
  func.func @_nary_tree_lstm_kernel(%arg0: i32, %arg1: memref<1x2x8xi32, #tpu.memory_space<vmem>>, %arg2: memref<1x2x16xi32, #tpu.memory_space<vmem>>, %arg3: memref<2x8x32xf32, #tpu.memory_space<vmem>>, %arg4: memref<2x8x32xf32, #tpu.memory_space<vmem>>, %arg5: memref<2x8x32xf32, #tpu.memory_space<vmem>>, %arg6: memref<32x128xf32, #tpu.memory_space<vmem>>, %arg7: memref<1x128xf32, #tpu.memory_space<vmem>>, %arg8: memref<32x256xf32, #tpu.memory_space<vmem>>, %arg9: memref<2x8x32xf32, #tpu.memory_space<vmem>>, %arg10: memref<2x8x32xf32, #tpu.memory_space<vmem>>, %arg11: memref<2x8x96xf32, #tpu.memory_space<vmem>>, %arg12: memref<2x24x32xf32, #tpu.memory_space<vmem>>, %arg13: memref<2x16x96xf32, #tpu.memory_space<vmem>>, %arg14: memref<2x8x32xf32, #tpu.memory_space<vmem>>, %arg15: memref<2x8x32xf32, #tpu.memory_space<vmem>>) attributes {dimension_semantics = [#tpu.dimension_semantics<arbitrary>], iteration_bounds = array<i64: 4>, scalar_prefetch = 0 : i64, scratch_operands = 5 : i64, tpu.core_type = #tpu.core_type<tc>, window_params = [{transform_indices = @transform_0, window_bounds = array<i64: 1, 2, 8>}, {transform_indices = @transform_1, window_bounds = array<i64: 1, 2, 16>}, {pipeline_mode = #tpu.pipeline_mode<synchronous>, transform_indices = @transform_2, window_bounds = array<i64: 2, 8, 32>}, {pipeline_mode = #tpu.pipeline_mode<synchronous>, transform_indices = @transform_3, window_bounds = array<i64: 2, 8, 32>}, {pipeline_mode = #tpu.pipeline_mode<synchronous>, transform_indices = @transform_4, window_bounds = array<i64: 2, 8, 32>}, {pipeline_mode = #tpu.pipeline_mode<synchronous>, transform_indices = @transform_5, window_bounds = array<i64: 32, 128>}, {pipeline_mode = #tpu.pipeline_mode<synchronous>, transform_indices = @transform_6, window_bounds = array<i64: 1, 128>}, {pipeline_mode = #tpu.pipeline_mode<synchronous>, transform_indices = @transform_7, window_bounds = array<i64: 32, 256>}, {pipeline_mode = #tpu.pipeline_mode<synchronous>, transform_indices = @transform_8, window_bounds = array<i64: 2, 8, 32>}, {pipeline_mode = #tpu.pipeline_mode<synchronous>, transform_indices = @transform_9, window_bounds = array<i64: 2, 8, 32>}]} {
    %c0_i32 = arith.constant 0 : i32
    %0 = arith.cmpi eq, %arg0, %c0_i32 : i32
    %1 = arith.extui %0 : i1 to i32
    %c0_i32_0 = arith.constant 0 : i32
    %2 = arith.cmpi ne, %1, %c0_i32_0 : i32
    scf.if %2 {
      %c0_49 = arith.constant 0 : index
      %c0_50 = arith.constant 0 : index
      %c0_51 = arith.constant 0 : index
      %103 = vector.load %arg3[%c0_49, %c0_50, %c0_51] : memref<2x8x32xf32, #tpu.memory_space<vmem>>, vector<2x8x32xf32>
      %104 = vector.shape_cast %103 : vector<2x8x32xf32> to vector<16x32xf32>
      %c0_52 = arith.constant 0 : index
      %c0_53 = arith.constant 0 : index
      %105 = vector.load %arg6[%c0_52, %c0_53] : memref<32x128xf32, #tpu.memory_space<vmem>>, vector<32x128xf32>
      %cst_54 = arith.constant dense<0.000000e+00> : vector<16x128xf32>
      %106 = tpu.matmul %104, %105, %cst_54 {dimension_numbers = #tpu.dot_dimension_numbers<[1], [0], [0], [1], [0, 0, 1, 1], [], []>} : vector<16x32xf32>, vector<32x128xf32>, vector<16x128xf32> -> vector<16x128xf32>
      %c0_55 = arith.constant 0 : index
      %c0_56 = arith.constant 0 : index
      %107 = vector.load %arg7[%c0_55, %c0_56] : memref<1x128xf32, #tpu.memory_space<vmem>>, vector<1x128xf32>
      %108 = vector.broadcast %107 : vector<1x128xf32> to vector<16x128xf32>
      %109 = arith.addf %106, %108 : vector<16x128xf32>
      %110 = vector.shape_cast %109 : vector<16x128xf32> to vector<2x8x128xf32>
      %111 = vector.extract_strided_slice %110 {offsets = [0, 0, 0], sizes = [2, 8, 96], strides = [1, 1, 1]} : vector<2x8x128xf32> to vector<2x8x96xf32>
      %c0_57 = arith.constant 0 : index
      %c0_58 = arith.constant 0 : index
      %c0_59 = arith.constant 0 : index
      %112 = vector.load %arg11[%c0_57, %c0_58, %c0_59] : memref<2x8x96xf32, #tpu.memory_space<vmem>>, vector<2x8x96xf32>
      tpu.vector_store %arg11[%c0_57, %c0_58, %c0_59], %111 {strides = array<i32>} : memref<2x8x96xf32, #tpu.memory_space<vmem>>, vector<2x8x96xf32>,
      %113 = vector.extract_strided_slice %110 {offsets = [0, 0, 96], sizes = [2, 8, 32], strides = [1, 1, 1]} : vector<2x8x128xf32> to vector<2x8x32xf32>
      %c0_60 = arith.constant 0 : index
      %c0_61 = arith.constant 0 : index
      %c0_62 = arith.constant 0 : index
      %114 = vector.load %arg12[%c0_60, %c0_61, %c0_62] : memref<2x24x32xf32, #tpu.memory_space<vmem>>, vector<2x8x32xf32>
      tpu.vector_store %arg12[%c0_60, %c0_61, %c0_62], %113 {strides = array<i32>} : memref<2x24x32xf32, #tpu.memory_space<vmem>>, vector<2x8x32xf32>,
      %c0_63 = arith.constant 0 : index
      %c0_64 = arith.constant 0 : index
      %c0_65 = arith.constant 0 : index
      %115 = vector.load %arg4[%c0_63, %c0_64, %c0_65] : memref<2x8x32xf32, #tpu.memory_space<vmem>>, vector<2x8x32xf32>
      %c0_66 = arith.constant 0 : index
      %c0_67 = arith.constant 0 : index
      %c0_68 = arith.constant 0 : index
      %116 = vector.load %arg14[%c0_66, %c0_67, %c0_68] : memref<2x8x32xf32, #tpu.memory_space<vmem>>, vector<2x8x32xf32>
      tpu.vector_store %arg14[%c0_66, %c0_67, %c0_68], %115 {strides = array<i32>} : memref<2x8x32xf32, #tpu.memory_space<vmem>>, vector<2x8x32xf32>,
      %c0_69 = arith.constant 0 : index
      %c0_70 = arith.constant 0 : index
      %c0_71 = arith.constant 0 : index
      %117 = vector.load %arg5[%c0_69, %c0_70, %c0_71] : memref<2x8x32xf32, #tpu.memory_space<vmem>>, vector<2x8x32xf32>
      %c0_72 = arith.constant 0 : index
      %c0_73 = arith.constant 0 : index
      %c0_74 = arith.constant 0 : index
      %118 = vector.load %arg15[%c0_72, %c0_73, %c0_74] : memref<2x8x32xf32, #tpu.memory_space<vmem>>, vector<2x8x32xf32>
      tpu.vector_store %arg15[%c0_72, %c0_73, %c0_74], %117 {strides = array<i32>} : memref<2x8x32xf32, #tpu.memory_space<vmem>>, vector<2x8x32xf32>,
    } else {
    }
    %c0 = arith.constant 0 : index
    %c0_1 = arith.constant 0 : index
    %c0_2 = arith.constant 0 : index
    %3 = vector.load %arg1[%c0, %c0_1, %c0_2] : memref<1x2x8xi32, #tpu.memory_space<vmem>>, vector<1x2x8xi32>
    %4 = vector.shape_cast %3 : vector<1x2x8xi32> to vector<2x8xi32>
    %c0_3 = arith.constant 0 : index
    %c0_4 = arith.constant 0 : index
    %c0_5 = arith.constant 0 : index
    %5 = vector.load %arg2[%c0_3, %c0_4, %c0_5] : memref<1x2x16xi32, #tpu.memory_space<vmem>>, vector<1x2x16xi32>
    %6 = vector.shape_cast %5 : vector<1x2x16xi32> to vector<2x16xi32>
    %7 = vector.extract_strided_slice %6 {offsets = [0, 0], sizes = [2, 8], strides = [1, 1]} : vector<2x16xi32> to vector<2x8xi32>
    %8 = vector.extract_strided_slice %6 {offsets = [0, 8], sizes = [2, 8], strides = [1, 1]} : vector<2x16xi32> to vector<2x8xi32>
    %c0_6 = arith.constant 0 : index
    %c0_7 = arith.constant 0 : index
    %c0_8 = arith.constant 0 : index
    %9 = vector.load %arg14[%c0_6, %c0_7, %c0_8] : memref<2x8x32xf32, #tpu.memory_space<vmem>>, vector<2x8x32xf32>
    %c0_9 = arith.constant 0 : index
    %c0_10 = arith.constant 0 : index
    %c0_11 = arith.constant 0 : index
    %10 = vector.load %arg15[%c0_9, %c0_10, %c0_11] : memref<2x8x32xf32, #tpu.memory_space<vmem>>, vector<2x8x32xf32>
    %11 = vector.shape_cast %9 : vector<2x8x32xf32> to vector<16x32xf32>
    %c0_12 = arith.constant 0 : index
    %c0_13 = arith.constant 0 : index
    %12 = vector.load %arg8[%c0_12, %c0_13] : memref<32x256xf32, #tpu.memory_space<vmem>>, vector<32x256xf32>
    %cst = arith.constant dense<0.000000e+00> : vector<16x256xf32>
    %13 = tpu.matmul %11, %12, %cst {dimension_numbers = #tpu.dot_dimension_numbers<[1], [0], [0], [1], [0, 0, 1, 1], [], []>} : vector<16x32xf32>, vector<32x256xf32>, vector<16x256xf32> -> vector<16x256xf32>
    %14 = vector.shape_cast %13 : vector<16x256xf32> to vector<2x8x256xf32>
    %15 = vector.extract_strided_slice %14 {offsets = [0, 0, 0], sizes = [2, 8, 96], strides = [1, 1, 1]} : vector<2x8x256xf32> to vector<2x8x96xf32>
    %c0_14 = arith.constant 0 : index
    %c0_15 = arith.constant 0 : index
    %c0_16 = arith.constant 0 : index
    %16 = vector.load %arg13[%c0_14, %c0_15, %c0_16] : memref<2x16x96xf32, #tpu.memory_space<vmem>>, vector<2x8x96xf32>
    tpu.vector_store %arg13[%c0_14, %c0_15, %c0_16], %15 {strides = array<i32>} : memref<2x16x96xf32, #tpu.memory_space<vmem>>, vector<2x8x96xf32>,
    %17 = vector.extract_strided_slice %14 {offsets = [0, 0, 128], sizes = [2, 8, 96], strides = [1, 1, 1]} : vector<2x8x256xf32> to vector<2x8x96xf32>
    %c0_17 = arith.constant 0 : index
    %c8 = arith.constant 8 : index
    %c0_18 = arith.constant 0 : index
    %18 = vector.load %arg13[%c0_17, %c8, %c0_18] : memref<2x16x96xf32, #tpu.memory_space<vmem>>, vector<2x8x96xf32>
    tpu.vector_store %arg13[%c0_17, %c8, %c0_18], %17 {strides = array<i32>} : memref<2x16x96xf32, #tpu.memory_space<vmem>>, vector<2x8x96xf32>,
    %19 = vector.extract_strided_slice %14 {offsets = [0, 0, 96], sizes = [2, 8, 32], strides = [1, 1, 1]} : vector<2x8x256xf32> to vector<2x8x32xf32>
    %c0_19 = arith.constant 0 : index
    %c8_20 = arith.constant 8 : index
    %c0_21 = arith.constant 0 : index
    %20 = vector.load %arg12[%c0_19, %c8_20, %c0_21] : memref<2x24x32xf32, #tpu.memory_space<vmem>>, vector<2x8x32xf32>
    tpu.vector_store %arg12[%c0_19, %c8_20, %c0_21], %19 {strides = array<i32>} : memref<2x24x32xf32, #tpu.memory_space<vmem>>, vector<2x8x32xf32>,
    %21 = vector.extract_strided_slice %14 {offsets = [0, 0, 224], sizes = [2, 8, 32], strides = [1, 1, 1]} : vector<2x8x256xf32> to vector<2x8x32xf32>
    %c0_22 = arith.constant 0 : index
    %c16 = arith.constant 16 : index
    %c0_23 = arith.constant 0 : index
    %22 = vector.load %arg12[%c0_22, %c16, %c0_23] : memref<2x24x32xf32, #tpu.memory_space<vmem>>, vector<2x8x32xf32>
    tpu.vector_store %arg12[%c0_22, %c16, %c0_23], %21 {strides = array<i32>} : memref<2x24x32xf32, #tpu.memory_space<vmem>>, vector<2x8x32xf32>,
    %23 = tpu.iota {dimensions = array<i32: 1>} : vector<2x8x16xi32>
    %24 = vector.shape_cast %6 : vector<2x16xi32> to vector<2x1x16xi32>
    %25 = vector.broadcast %24 : vector<2x1x16xi32> to vector<2x8x16xi32>
    %26 = arith.cmpi eq, %25, %23 : vector<2x8x16xi32>
    %27 = arith.extui %26 : vector<2x8x16xi1> to vector<2x8x16xi32>
    %28 = arith.sitofp %27 : vector<2x8x16xi32> to vector<2x8x16xf32>
    %c0_24 = arith.constant 0 : index
    %c0_25 = arith.constant 0 : index
    %c0_26 = arith.constant 0 : index
    %29 = vector.load %arg11[%c0_24, %c0_25, %c0_26] : memref<2x8x96xf32, #tpu.memory_space<vmem>>, vector<2x8x96xf32>
    %c0_27 = arith.constant 0 : index
    %c0_28 = arith.constant 0 : index
    %c0_29 = arith.constant 0 : index
    %30 = vector.load %arg13[%c0_27, %c0_28, %c0_29] : memref<2x16x96xf32, #tpu.memory_space<vmem>>, vector<2x16x96xf32>
    "tpu.trace_start"() <{level = 10 : i32, message = "btj,bjo->bto"}> : () -> ()
    %cst_30 = arith.constant dense<0.000000e+00> : vector<2x8x96xf32>
    %31 = tpu.matmul %28, %30, %cst_30 {dimension_numbers = #tpu.dot_dimension_numbers<[2], [1], [1], [2], [0, 0, 0, 1, 1, 2], [0], [0]>} : vector<2x8x16xf32>, vector<2x16x96xf32>, vector<2x8x96xf32> -> vector<2x8x96xf32>
    "tpu.trace_stop"() : () -> ()
    %32 = arith.addf %29, %31 : vector<2x8x96xf32>
    %33 = vector.extract_strided_slice %32 {offsets = [0, 0, 0], sizes = [2, 8, 32], strides = [1, 1, 1]} : vector<2x8x96xf32> to vector<2x8x32xf32>
    %34 = arith.negf %33 : vector<2x8x32xf32>
    %35 = math.exp %34 : vector<2x8x32xf32>
    %cst_31 = arith.constant 1.000000e+00 : f32
    %36 = vector.broadcast %cst_31 : f32 to vector<2x8x32xf32>
    %37 = arith.addf %36, %35 : vector<2x8x32xf32>
    %38 = arith.divf %36, %37 : vector<2x8x32xf32>
    %39 = vector.extract_strided_slice %32 {offsets = [0, 0, 32], sizes = [2, 8, 32], strides = [1, 1, 1]} : vector<2x8x96xf32> to vector<2x8x32xf32>
    %40 = arith.negf %39 : vector<2x8x32xf32>
    %41 = math.exp %40 : vector<2x8x32xf32>
    %cst_32 = arith.constant 1.000000e+00 : f32
    %42 = vector.broadcast %cst_32 : f32 to vector<2x8x32xf32>
    %43 = arith.addf %42, %41 : vector<2x8x32xf32>
    %44 = arith.divf %42, %43 : vector<2x8x32xf32>
    %45 = vector.extract_strided_slice %32 {offsets = [0, 0, 64], sizes = [2, 8, 32], strides = [1, 1, 1]} : vector<2x8x96xf32> to vector<2x8x32xf32>
    %46 = math.tanh %45 : vector<2x8x32xf32>
    %47 = tpu.iota {dimensions = array<i32: 2>} : vector<2x8x24xi32>
    %48 = vector.shape_cast %4 : vector<2x8xi32> to vector<2x8x1xi32>
    %49 = vector.broadcast %48 : vector<2x8x1xi32> to vector<2x8x24xi32>
    %50 = arith.cmpi eq, %47, %49 : vector<2x8x24xi32>
    %51 = vector.shape_cast %7 : vector<2x8xi32> to vector<2x8x1xi32>
    %c8_i32 = arith.constant 8 : i32
    %52 = vector.broadcast %c8_i32 : i32 to vector<2x8x1xi32>
    %53 = arith.addi %51, %52 : vector<2x8x1xi32>
    %54 = vector.broadcast %53 : vector<2x8x1xi32> to vector<2x8x24xi32>
    %55 = arith.cmpi eq, %47, %54 : vector<2x8x24xi32>
    %56 = arith.ori %50, %55 : vector<2x8x24xi1>
    %57 = vector.shape_cast %8 : vector<2x8xi32> to vector<2x8x1xi32>
    %c16_i32 = arith.constant 16 : i32
    %58 = vector.broadcast %c16_i32 : i32 to vector<2x8x1xi32>
    %59 = arith.addi %57, %58 : vector<2x8x1xi32>
    %60 = vector.broadcast %59 : vector<2x8x1xi32> to vector<2x8x24xi32>
    %61 = arith.cmpi eq, %47, %60 : vector<2x8x24xi32>
    %62 = arith.ori %56, %61 : vector<2x8x24xi1>
    %63 = arith.extui %62 : vector<2x8x24xi1> to vector<2x8x24xi32>
    %64 = arith.sitofp %63 : vector<2x8x24xi32> to vector<2x8x24xf32>
    %c0_33 = arith.constant 0 : index
    %c0_34 = arith.constant 0 : index
    %c0_35 = arith.constant 0 : index
    %65 = vector.load %arg12[%c0_33, %c0_34, %c0_35] : memref<2x24x32xf32, #tpu.memory_space<vmem>>, vector<2x24x32xf32>
    "tpu.trace_start"() <{level = 10 : i32, message = "bsj,bjh->bsh"}> : () -> ()
    %cst_36 = arith.constant dense<0.000000e+00> : vector<2x8x32xf32>
    %66 = tpu.matmul %64, %65, %cst_36 {dimension_numbers = #tpu.dot_dimension_numbers<[2], [1], [1], [2], [0, 0, 0, 1, 1, 2], [0], [0]>} : vector<2x8x24xf32>, vector<2x24x32xf32>, vector<2x8x32xf32> -> vector<2x8x32xf32>
    "tpu.trace_stop"() : () -> ()
    %67 = arith.negf %66 : vector<2x8x32xf32>
    %68 = math.exp %67 : vector<2x8x32xf32>
    %cst_37 = arith.constant 1.000000e+00 : f32
    %69 = vector.broadcast %cst_37 : f32 to vector<2x8x32xf32>
    %70 = arith.addf %69, %68 : vector<2x8x32xf32>
    %71 = arith.divf %69, %70 : vector<2x8x32xf32>
    %72 = tpu.iota {dimensions = array<i32: 1>} : vector<2x8x8xi32>
    %73 = vector.shape_cast %4 : vector<2x8xi32> to vector<2x1x8xi32>
    %74 = vector.broadcast %73 : vector<2x1x8xi32> to vector<2x8x8xi32>
    %75 = arith.cmpi eq, %74, %72 : vector<2x8x8xi32>
    %76 = arith.extui %75 : vector<2x8x8xi1> to vector<2x8x8xi32>
    %77 = arith.sitofp %76 : vector<2x8x8xi32> to vector<2x8x8xf32>
    %78 = arith.mulf %71, %10 : vector<2x8x32xf32>
    %79 = arith.mulf %38, %46 : vector<2x8x32xf32>
    "tpu.trace_start"() <{level = 10 : i32, message = "bts,bsh->bth"}> : () -> ()
    %cst_38 = arith.constant dense<0.000000e+00> : vector<2x8x32xf32>
    %80 = tpu.matmul %77, %78, %cst_38 {dimension_numbers = #tpu.dot_dimension_numbers<[2], [1], [1], [2], [0, 0, 0, 1, 1, 2], [0], [0]>} : vector<2x8x8xf32>, vector<2x8x32xf32>, vector<2x8x32xf32> -> vector<2x8x32xf32>
    "tpu.trace_stop"() : () -> ()
    %81 = arith.addf %79, %80 : vector<2x8x32xf32>
    %82 = math.tanh %81 : vector<2x8x32xf32>
    %83 = arith.mulf %44, %82 : vector<2x8x32xf32>
    %cst_39 = arith.constant dense<0.000000e+00> : vector<2x8xf32>
    %84 = vector.multi_reduction <add>, %77, %cst_39 [2] : vector<2x8x8xf32> to vector<2x8xf32>
    %85 = tpu.iota {dimensions = array<i32: 1>} : vector<2x8xi32>
    %cst_40 = arith.constant 0.000000e+00 : f32
    %86 = vector.broadcast %cst_40 : f32 to vector<2x8xf32>
    %87 = arith.cmpf ogt, %84, %86 : vector<2x8xf32>
    %c0_i32_41 = arith.constant 0 : i32
    %88 = vector.broadcast %c0_i32_41 : i32 to vector<2x8xi32>
    %89 = arith.cmpi sgt, %85, %88 : vector<2x8xi32>
    %90 = arith.andi %87, %89 : vector<2x8xi1>
    %91 = vector.shape_cast %90 : vector<2x8xi1> to vector<2x8x1xi1>
    %92 = vector.shape_cast %91 : vector<2x8x1xi1> to vector<2x8x1xi1>
    %93 = vector.broadcast %92 : vector<2x8x1xi1> to vector<2x8x32xi1>
    %94 = arith.select %93, %83, %9 : vector<2x8x32xi1>, vector<2x8x32xf32>
    %95 = vector.shape_cast %91 : vector<2x8x1xi1> to vector<2x8x1xi1>
    %96 = vector.broadcast %95 : vector<2x8x1xi1> to vector<2x8x32xi1>
    %97 = arith.select %96, %81, %10 : vector<2x8x32xi1>, vector<2x8x32xf32>
    %c0_42 = arith.constant 0 : index
    %c0_43 = arith.constant 0 : index
    %c0_44 = arith.constant 0 : index
    %98 = vector.load %arg14[%c0_42, %c0_43, %c0_44] : memref<2x8x32xf32, #tpu.memory_space<vmem>>, vector<2x8x32xf32>
    tpu.vector_store %arg14[%c0_42, %c0_43, %c0_44], %94 {strides = array<i32>} : memref<2x8x32xf32, #tpu.memory_space<vmem>>, vector<2x8x32xf32>,
    %c0_45 = arith.constant 0 : index
    %c0_46 = arith.constant 0 : index
    %c0_47 = arith.constant 0 : index
    %99 = vector.load %arg15[%c0_45, %c0_46, %c0_47] : memref<2x8x32xf32, #tpu.memory_space<vmem>>, vector<2x8x32xf32>
    tpu.vector_store %arg15[%c0_45, %c0_46, %c0_47], %97 {strides = array<i32>} : memref<2x8x32xf32, #tpu.memory_space<vmem>>, vector<2x8x32xf32>,
    %c3_i32 = arith.constant 3 : i32
    %100 = arith.cmpi eq, %arg0, %c3_i32 : i32
    %101 = arith.extui %100 : i1 to i32
    %c0_i32_48 = arith.constant 0 : i32
    %102 = arith.cmpi ne, %101, %c0_i32_48 : i32
    scf.if %102 {
      %c0_49 = arith.constant 0 : index
      %c0_50 = arith.constant 0 : index
      %c0_51 = arith.constant 0 : index
      %103 = vector.load %arg9[%c0_49, %c0_50, %c0_51] : memref<2x8x32xf32, #tpu.memory_space<vmem>>, vector<2x8x32xf32>
      tpu.vector_store %arg9[%c0_49, %c0_50, %c0_51], %94 {strides = array<i32>} : memref<2x8x32xf32, #tpu.memory_space<vmem>>, vector<2x8x32xf32>,
      %c0_52 = arith.constant 0 : index
      %c0_53 = arith.constant 0 : index
      %c0_54 = arith.constant 0 : index
      %104 = vector.load %arg10[%c0_52, %c0_53, %c0_54] : memref<2x8x32xf32, #tpu.memory_space<vmem>>, vector<2x8x32xf32>
      tpu.vector_store %arg10[%c0_52, %c0_53, %c0_54], %97 {strides = array<i32>} : memref<2x8x32xf32, #tpu.memory_space<vmem>>, vector<2x8x32xf32>,
    } else {
    }
    return
  }
  func.func @transform_0(%arg0: i32) -> (i32, i32, i32) {
    %c0_i32 = arith.constant 0 : i32
    %c0_i32_0 = arith.constant 0 : i32
    %c0_i32_1 = arith.constant 0 : i32
    return %arg0, %c0_i32, %c0_i32_0 : i32, i32, i32
  }
  func.func @transform_1(%arg0: i32) -> (i32, i32, i32) {
    %c0_i32 = arith.constant 0 : i32
    %c0_i32_0 = arith.constant 0 : i32
    %c0_i32_1 = arith.constant 0 : i32
    return %arg0, %c0_i32, %c0_i32_0 : i32, i32, i32
  }
  func.func @transform_2(%arg0: i32) -> (i32, i32, i32) {
    %c0_i32 = arith.constant 0 : i32
    %c0_i32_0 = arith.constant 0 : i32
    %c0_i32_1 = arith.constant 0 : i32
    %c0_i32_2 = arith.constant 0 : i32
    return %c0_i32, %c0_i32_0, %c0_i32_1 : i32, i32, i32
  }
  func.func @transform_3(%arg0: i32) -> (i32, i32, i32) {
    %c0_i32 = arith.constant 0 : i32
    %c0_i32_0 = arith.constant 0 : i32
    %c0_i32_1 = arith.constant 0 : i32
    %c0_i32_2 = arith.constant 0 : i32
    return %c0_i32, %c0_i32_0, %c0_i32_1 : i32, i32, i32
  }
  func.func @transform_4(%arg0: i32) -> (i32, i32, i32) {
    %c0_i32 = arith.constant 0 : i32
    %c0_i32_0 = arith.constant 0 : i32
    %c0_i32_1 = arith.constant 0 : i32
    %c0_i32_2 = arith.constant 0 : i32
    return %c0_i32, %c0_i32_0, %c0_i32_1 : i32, i32, i32
  }
  func.func @transform_5(%arg0: i32) -> (i32, i32) {
    %c0_i32 = arith.constant 0 : i32
    %c0_i32_0 = arith.constant 0 : i32
    %c0_i32_1 = arith.constant 0 : i32
    return %c0_i32, %c0_i32_0 : i32, i32
  }
  func.func @transform_6(%arg0: i32) -> (i32, i32) {
    %c0_i32 = arith.constant 0 : i32
    %c0_i32_0 = arith.constant 0 : i32
    %c0_i32_1 = arith.constant 0 : i32
    return %c0_i32, %c0_i32_0 : i32, i32
  }
  func.func @transform_7(%arg0: i32) -> (i32, i32) {
    %c0_i32 = arith.constant 0 : i32
    %c0_i32_0 = arith.constant 0 : i32
    %c0_i32_1 = arith.constant 0 : i32
    return %c0_i32, %c0_i32_0 : i32, i32
  }
  func.func @transform_8(%arg0: i32) -> (i32, i32, i32) {
    %c0_i32 = arith.constant 0 : i32
    %c0_i32_0 = arith.constant 0 : i32
    %c0_i32_1 = arith.constant 0 : i32
    %c0_i32_2 = arith.constant 0 : i32
    return %c0_i32, %c0_i32_0, %c0_i32_1 : i32, i32, i32
  }
  func.func @transform_9(%arg0: i32) -> (i32, i32, i32) {
    %c0_i32 = arith.constant 0 : i32
    %c0_i32_0 = arith.constant 0 : i32
    %c0_i32_1 = arith.constant 0 : i32
    %c0_i32_2 = arith.constant 0 : i32
    return %c0_i32, %c0_i32_0, %c0_i32_1 : i32, i32, i32
  }
}

</mosaic_0001>

<bundles_post_ra>
// kernel: nary_tree_lstm_levels.1
= control target key start
LH: loop header
LB: loop body
LE: loop exit
PB: predicated region body
PF: predicated region fallthrough
CT: control target
= control target key end

     0   :  { %15 = vsyncpa [#allocation8], 0  ;;  %s2296_s0 = inlined_call_operand.vmem [shape: s32[4,2,8], index: 0, kind: input, shape index: {}]   ;;  %s2297_s1 = inlined_call_operand.vmem [shape: s32[4,2,16], index: 1, kind: input, shape index: {}]   ;;  %s2298_s2 = inlined_call_operand.hbm [shape: f32[2,8,32], index: 2, kind: input, shape index: {}]   ;;  %s2299_s3 = inlined_call_operand.hbm [shape: f32[2,8,32], index: 3, kind: input, shape index: {}]   ;;  %s2300_s4 = inlined_call_operand.hbm [shape: f32[2,8,32], index: 4, kind: input, shape index: {}]   ;;  %s2301_s5 = inlined_call_operand.vmem [shape: f32[32,128], index: 5, kind: input, shape index: {}]   ;;  %s2302_s6 = inlined_call_operand.vmem [shape: f32[1,128], index: 6, kind: input, shape index: {}]   ;;  %s2303_s7 = inlined_call_operand.hbm [shape: f32[32,256], index: 7, kind: input, shape index: {}]   ;;  %s2304_s8 = inlined_call_operand.hbm [shape: f32[2,8,32], index: 8, kind: output, shape index: {0}]   ;;  %s2305_s9 = inlined_call_operand.hbm [shape: f32[2,8,32], index: 9, kind: output, shape index: {1}]  }
   0x1   :  { %16 = vsyncpa [#allocation11], 0 }
   0x2   :  { %17 = vsyncpa [#allocation14], 0 }
   0x3   :  { %18 = vsyncpa [#allocation9], 0 }
   0x4   :  { %19 = vsyncpa [#allocation17], 0  ;;  %s1967_s30 = smov 0  }
   0x5 LB: > { %s1973_s10 = sadd.s32 4294967295, %s1894_s30   ;;  %p1453_p0 = scmp.ge.s32.totalorder %s1894_s30, 1  ;;  %s1894_s30 = sphi %s1967_s30, %s25_s30  }
   0x6   : > { %p250_p1 = scmp.lt.s32.totalorder %s1894_s30, 5  ;;  %p2306_p3 = scmp.eq.s32.totalorder %s1973_s10, 0 }
   0x7   : > { %s1896_s12 = smov [#allocation10]   ;;  %s1897_s14 = smov [#allocation7]  }
   0x8   : > { %p1979_p4 = pnand %p1453_p0, %p250_p1  ;;  %s275_s13 = sshll.u32 %s1896_s12, 4  ;;  %s1983_s13 = int_to_ptr.vmem [resolvable:$true] %s275_s13 }
   0x9   : > { %s262_s15 = sshll.u32 %s1897_s14, 4  ;;  %s1898_s17 = smov [#allocation12]   ;;  %s1987_s15 = int_to_ptr.vmem [resolvable:$true] %s262_s15 }
   0xa   : > { %s2308_s11 = scalar_select %p1979_p4, 1, 0 }
   0xb   : > { %p1624_p5 = pneg %p1979_p4  ;;  %s288_s18 = sshll.u32 %s1898_s17, 4  ;;  %s1995_s18 = int_to_ptr.vmem [resolvable:$true] %s288_s18 }
   0xc   : > { %s1899_s19 = smov [#allocation13]   ;;  %s1704_s23 = scalar_lea.hbm %s2299_s3, 256 }
   0xd   : > { %p1991_p6 = pnand %p2306_p3, %p1624_p5  ;;  %s1997_s20 = sshll.u32 %s1899_s19, 4  ;;  %s308_s20 = int_to_ptr.vmem [resolvable:$true] %s1997_s20 }
   0xe   : > { %p1705_p7 = scmp.ne.s32.totalorder %s2299_s3, %s1704_s23  ;;  %p1711_p11 = scmp.lt.u32.totalorder %s1704_s23, %s2299_s3 }
   0xf   : > { %p2007_p8 = pneg %p1991_p6 }
  0x11   : > { %p1707_p9 = pnand %p2007_p8, %p1705_p7 }
  0x13   : > { %p1708_p10 = pneg %p1707_p9 }
  0x15   : > { %p1713_p12 = pnand %p1711_p11, %p1708_p10 }
  0x17   : > { %1716 = shalt.err (!%p1713_p12)
}
  0x18   : > { %s1717_s29 = scalar_lea.vmem %s1983_s13, 256  ;;  %p1725_p5 = scmp.lt.s32.totalorder %s1983_s13, %s1983_s13 }
  0x19   : > { %p1718_p13 = scmp.ne.s32.totalorder %s1983_s13, %s1717_s29  ;;  %p1726_p2 = scmp.lt.s32.totalorder %s1717_s29, %s1717_s29 }
  0x1b   : > { %p1720_p0 = pnand %p1718_p13, %p2007_p8  ;;  %p1727_p7 = por %p1726_p2, %p1725_p5 }
  0x1d   : > { %p1721_p1 = pneg %p1720_p0 }
  0x1f   : > { %p1728_p9 = pnand %p1727_p7, %p1721_p1 }
  0x21   : > { %1731 = shalt.err (!%p1728_p9)
}
  0x22   : > { %s1900_s12 = smov 128   ;;  %s1901_s14 = smov 8  }
  0x23   : > { %1630 = dma.hbm_to_vmem [thread:$0]  (!%p1991_p6), %s2299_s3, 256, %s1983_s13, [#allocation11], %s1900_s12, %s1900_s12, %s1901_s14  }
  0x24   : > { %s1732_s23 = scalar_lea.hbm %s2298_s2, 256 }
  0x25   : > { %p1733_p2 = scmp.ne.s32.totalorder %s2298_s2, %s1732_s23  ;;  %p1739_p12 = scmp.lt.u32.totalorder %s1732_s23, %s2298_s2 }
  0x27   : > { %p1735_p10 = pnand %p1733_p2, %p2007_p8 }
  0x29   : > { %p1736_p11 = pneg %p1735_p10 }
  0x2b   : > { %p1741_p13 = pnand %p1739_p12, %p1736_p11 }
  0x2d   : > { %1744 = shalt.err (!%p1741_p13)
}
  0x2e   : > { %s1745_s13 = scalar_lea.vmem %s1987_s15, 256  ;;  %p1753_p7 = scmp.lt.s32.totalorder %s1987_s15, %s1987_s15 }
  0x2f   : > { %p1746_p0 = scmp.ne.s32.totalorder %s1987_s15, %s1745_s13  ;;  %p1754_p9 = scmp.lt.s32.totalorder %s1745_s13, %s1745_s13 }
  0x31   : > { %p1748_p1 = pnand %p1746_p0, %p2007_p8  ;;  %p1755_p2 = por %p1754_p9, %p1753_p7 }
  0x33   : > { %p1749_p5 = pneg %p1748_p1 }
  0x35   : > { %p1756_p10 = pnand %p1755_p2, %p1749_p5 }
  0x37   : > { %1759 = shalt.err (!%p1756_p10)
}
  0x38   : > { %1627 = dma.hbm_to_vmem [thread:$0]  (!%p1991_p6), %s2298_s2, 256, %s1987_s15, [#allocation8], %s1900_s12, %s1900_s12, %s1901_s14  }
  0x39   : > { %s1760_s22 = scalar_lea.hbm %s2300_s4, 256 }
  0x3a   : > { %p1761_p11 = scmp.ne.s32.totalorder %s2300_s4, %s1760_s22  ;;  %p1767_p0 = scmp.lt.u32.totalorder %s1760_s22, %s2300_s4 }
  0x3c   : > { %p1763_p12 = pnand %p1761_p11, %p2007_p8 }
  0x3e   : > { %p1764_p13 = pneg %p1763_p12 }
  0x40   : > { %p1769_p1 = pnand %p1767_p0, %p1764_p13 }
  0x42   : > { %1772 = shalt.err (!%p1769_p1)
}
  0x43   : > { %s1773_s15 = scalar_lea.vmem %s1995_s18, 256  ;;  %p1781_p2 = scmp.lt.s32.totalorder %s1995_s18, %s1995_s18 }
  0x44   : > { %p1774_p5 = scmp.ne.s32.totalorder %s1995_s18, %s1773_s15  ;;  %p1782_p10 = scmp.lt.s32.totalorder %s1773_s15, %s1773_s15 }
  0x46   : > { %p1776_p7 = pnand %p1774_p5, %p2007_p8  ;;  %p1783_p11 = por %p1782_p10, %p1781_p2 }
  0x48   : > { %p1777_p9 = pneg %p1776_p7 }
  0x4a   : > { %p1784_p12 = pnand %p1783_p11, %p1777_p9 }
  0x4c   : > { %1787 = shalt.err (!%p1784_p12)
}
  0x4d   : > { %1633 = dma.hbm_to_vmem [thread:$0]  (!%p1991_p6), %s2300_s4, 256, %s1995_s18, [#allocation11], %s1900_s12, %s1900_s12, %s1901_s14  }
  0x4e   : > { %s1788_s19 = scalar_lea.hbm %s2303_s7, 1024 }
  0x4f   : > { %p1789_p13 = scmp.ne.s32.totalorder %s2303_s7, %s1788_s19  ;;  %p1795_p5 = scmp.lt.u32.totalorder %s1788_s19, %s2303_s7 }
  0x51   : > { %p1791_p0 = pnand %p1789_p13, %p2007_p8 }
  0x53   : > { %p1792_p1 = pneg %p1791_p0 }
  0x55   : > { %p1797_p7 = pnand %p1795_p5, %p1792_p1 }
  0x57   : > { %1800 = shalt.err (!%p1797_p7)
}
  0x58   : > { %s1801_s25 = scalar_lea.vmem %s308_s20, 1024  ;;  %p1809_p11 = scmp.lt.s32.totalorder %s308_s20, %s308_s20 }
  0x59   : > { %p1802_p9 = scmp.ne.s32.totalorder %s308_s20, %s1801_s25  ;;  %p1810_p12 = scmp.lt.s32.totalorder %s1801_s25, %s1801_s25 }
  0x5b   : > { %p1804_p2 = pnand %p1802_p9, %p2007_p8  ;;  %p1811_p3 = por %p1810_p12, %p1809_p11 }
  0x5d   : > { %p1805_p10 = pneg %p1804_p2 }
  0x5f   : > { %p1812_p4 = pnand %p1811_p3, %p1805_p10 }
  0x61   : > { %1815 = shalt.err (!%p1812_p4)
}
  0x62   : > { %s1902_s18 = smov 256   ;;  %s1903_s12 = smov 16  }
  0x63   : > { %1636 = dma.hbm_to_vmem [thread:$0]  (!%p1991_p6), %s2303_s7, 1024, %s308_s20, [#allocation14], %s1902_s18, %s1902_s18, %s1903_s12  }
  0x64   : > { %p2311_p13 = scmp.ne.s32.totalorder %s2308_s11, 0 }
  0x65   : > { %p2312_p0 = scmp.eq.s32.totalorder (!%p2311_p13), %s1973_s10, 0 }
  0x66   : > { %337 = sbr.rel (%p2311_p13) target bundleno = 1579 (0x62b), region = 52 }
  0x6d   : > { %1873 = dma.done.wait (%p2312_p0), [#allocation8], 256   ;;  %p2313_p8 = pmov %p2312_p0 }
  0x6e   : > { %p2314_p3 = pmov %p2312_p0 }
  0x6f   : > { %1875 = vsyncadd (%p2313_p8), [#allocation8], 4294967040 }
  0x70   : > { %1877 = dma.done.wait (%p2314_p3), [#allocation11], 512   ;;  %p2315_p4 = pmov %p2312_p0 }
  0x71   : > { %p2316_p1 = pmov %p2312_p0 }
  0x72   : > { %1879 = vsyncadd (%p2315_p4), [#allocation11], 4294966784 }
  0x73   : > { %1881 = dma.done.wait (%p2316_p1), [#allocation14], 1024   ;;  %p2317_p6 = pmov %p2312_p0 }
  0x74   : > { %p383_p5 = scmp.lt.s32.totalorder %s1973_s10, 3  ;;  %p2318_p7 = scmp.ne.s32.totalorder %s1973_s10, 0 }
  0x75   : > { %1883 = vsyncadd (%p2317_p6), [#allocation14], 4294966272  ;;  %v397_v0 = vld [vmem:[%s2301_s5] sm:$0xff] (!%p2318_p7)  ;;  %v398_v1 = vld [vmem:[%s2301_s5 + $0x8] sm:$0xff] (!%p2318_p7)  ;;  %vm408_vm0 = vcmask (!%p2318_p7), 261120   ;;  %vm490_vm1 = vcmask (!%p2318_p7), 785408  }
  0x76   : > { %s384_s11 = scalar_select %p383_p5, %s1973_s10, 3 }
  0x77   : > { %394 = sbr.rel (%p2318_p7) target bundleno = 464 (0x1d0), region = 72  ;;  %v399_v2 = vld [vmem:[%s2301_s5 + $0x10] sm:$0xff] (!%p2318_p7)  ;;  %v1572_v3 = vpack.c.bf16 (!%p2318_p7), %v398_v1, %v397_v0  ;;  %v400_v4 = vld [vmem:[%s2301_s5 + $0x18] sm:$0xff] (!%p2318_p7)  ;;  %v395_v5 = vld [vmem:[#allocation7] sm:$0xff] (!%p2318_p7)  ;;  %s1904_s27 = smov (!%p2318_p7), 32  }
  0x78   : > { %s1464_s16 = sshll.u32 %s384_s11, 1  ;;  %v503_v6 = vld [vmem:[#allocation10] sm:$0xff] (!%p2318_p7)  ;;  %v1576_v7 = vpack.c.bf16 (!%p2318_p7), %v400_v4, %v399_v2  ;;  %1527 = vmatprep.mubr.msk.f32.mxu0 (!%p2318_p7), %vm408_vm0, %v395_v5  ;;  %v504_v8 = vld [vmem:[#allocation10 + $0x8] sm:$0xff] (!%p2318_p7)  ;;  %v507_v9 = vld [vmem:[#allocation12] sm:$0xff] (!%p2318_p7) }
  0x79   : > { %s2121_s15 = scalar_lea.vmem %s2296_s0, %s1464_s16  ;;  %s2126_s29 = scalar_lea.vmem %s2297_s1, %s1464_s16  ;;  %505 = vst.msk [vmem:[#allocation5] sm:$0xff] (!%p2318_p7), %vm408_vm0, %v503_v6  ;;  %v508_v10 = vld [vmem:[#allocation12 + $0x8] sm:$0xff] (!%p2318_p7)  ;;  %1573 = vmatprep.subr.bf16.mxu0 (!%p2318_p7), %v1572_v3  ;;  %506 = vst.msk [vmem:[#allocation5 + $0x8] sm:$0xff] (!%p2318_p7), %vm408_vm0, %v504_v8  ;;  %v1467_v12 = vld [vmem:[%s2302_s6] ss:$0 sm:$0xff] (!%p2318_p7) }
  0x7a   : > { %509 = vst.msk [vmem:[#allocation6] sm:$0xff] (!%p2318_p7), %vm408_vm0, %v507_v9  ;;  %510 = vst.msk [vmem:[#allocation6 + $0x8] sm:$0xff] (!%p2318_p7), %vm408_vm0, %v508_v10  ;;  %1575 = vmatpush3.bf16.msra.mxu0 (!%p2318_p7), %v1572_v3  ;;  %v396_v11 = vld [vmem:[#allocation7 + $0x8] sm:$0xff] (!%p2318_p7) }
  0x7b   : > { %1577 = vmatprep.subr.bf16.mxu0 (!%p2318_p7), %v1576_v7 }
  0x7e   : > { %1579 = vmatpush3.bf16.msra.mxu0 %v1576_v7 }
  0x81   : > { %1528 = vmatmul.mubr.msk.f32.vlgmr.msra.gmra.mrb[0].mxu0 %vm408_vm0, %v396_v11 }
 0x154   : > { %v1529_v13 = vpop.f32.mrb[0].mxu0 }
 0x155   : > { %v487_v14 = vadd.f32 %v1529_v13, %v1467_v12  ;;  %v481_v15 = vpop.f32.mrb[1].mxu0 }
 0x156   : > { %v482_v16 = vadd.f32 %v1467_v12, %v481_v15 }
 0x157   : > { %492 = vst.msk [vmem:[#allocation2 + $0x8] sm:$0xff] %vm490_vm1, %v487_v14 }
 0x158   : > { %491 = vst.msk [vmem:[#allocation2] sm:$0xff] %vm490_vm1, %v482_v16  ;;  %495 = vrot.lane.b32.xlu0 %v482_v16, %s1904_s27 }
 0x15c   : > { %497 = vrot.lane.b32.xlu0 %v487_v14, %s1904_s27 }
 0x1ca   : > { %v496_v17 = vpop.permute.xlu0 %495 }
 0x1cb   : > { %501 = vst.msk [vmem:[#allocation3] sm:$0xff] %vm408_vm0, %v496_v17 }
 0x1ce   : > { %v498_v18 = vpop.permute.xlu0 %497 }
 0x1cf   : > { %502 = vst.msk [vmem:[#allocation3 + $0x18] sm:$0xff] %vm408_vm0, %v498_v18 }
 0x1d0 PF: > { %v518_v19 = vld [vmem:[#allocation13 + $0x8] sm:$0xff]  ;;  %v520_v20 = vld [vmem:[#allocation13 + $0x18] sm:$0xff]  ;;  %v517_v21 = vld [vmem:[#allocation13] sm:$0xff]  ;;  %v1905_v26 = vmov 0.0   ;;  %vm525_vm2 = vcmask 261120   ;;  %v1906_v34 = vmov 0.0|0.0   ;;  %v634_v37 = vlaneseq }
 0x1d1   : > { %v1580_v22 = vpack.c.bf16 %v520_v20, %v518_v19  ;;  %v519_v23 = vld [vmem:[#allocation13 + $0x10] sm:$0xff]  ;;  %v522_v24 = vld [vmem:[#allocation13 + $0x28] sm:$0xff]  ;;  %v524_v25 = vld [vmem:[#allocation13 + $0x38] sm:$0xff]  ;;  %596 = vmatprep.mubr.f32.mxu0 %v1905_v26  ;;  %1588 = vmatprep.subr.bf16.mxu1 %v1906_v34  ;;  %vm1907_vm3 = vmmov 0   ;;  %v1908_v35 = vmov 1966171168  }
 0x1d2   : > { %v1582_v27 = vpack.c.bf16 %v519_v23, %v517_v21  ;;  %v1584_v28 = vpack.c.bf16 %v524_v25, %v522_v24  ;;  %v521_v29 = vld [vmem:[#allocation13 + $0x20] sm:$0xff]  ;;  %v523_v30 = vld [vmem:[#allocation13 + $0x30] sm:$0xff]  ;;  %v2159_v33 = vld [vmem:[#allocation5 + $0x8] sm:$0xff]  ;;  %1534 = vmatprep.mubr.msk.f32.mxu1 %vm1907_vm3, %v1905_v26  ;;  %v637_v36 = vunpack.c.l.s4 %v1908_v35  ;;  %v2168_v39 = vshrl.u32 %v634_v37, 7  ;;  %s1909_s11 = smov 32   ;;  %s1911_s16 = smov 64  }
 0x1d3   : > { %1581 = vmatprep.subr.bf16.mxu0 %v1580_v22  ;;  %v1586_v31 = vpack.c.bf16 %v523_v30, %v521_v29  ;;  %v2154_v32 = vld [vmem:[#allocation5] sm:$0xff]  ;;  %vm609_vm4 = vcmask 785408   ;;  %vm678_vm6 = vcmask 130048   ;;  %vm1110_vm9 = vcmask 64512   ;;  %v897_v17 = vld [vmem:[#allocation3] sm:$0xff]  ;;  %s1912_s20 = smov 96  }
 0x1d4   : > { %1583 = vmatpush1.bf16.msra.mxu0 %v1582_v27  ;;  %v638_v38 = vunpack.c.0.s8 %v637_v36  ;;  %v512_v41 = vld [vmem:[%s2126_s29] sm:$0x3]  ;;  %v852_v43 = vsub.s32 1, %v2168_v39  ;;  %v660_v48 = vsub.s32 0, %v2168_v39  ;;  %v1910_v18 = vmov 0   ;;  %p1488_p9 = scmp.ne.s32.totalorder %s1973_s10, 3 }
 0x1d5   : > { %1585 = vmatprep.subr.bf16.mxu0 %v1584_v28  ;;  %v511_v59 = vld [vmem:[%s2121_s15] sm:$0x3]  ;;  %1678 = vset.pattern.permute.xlu1 %v1910_v18  ;;  %v842_v28 = vand.u32 127, %v634_v37  ;;  %vm903_vm1 = vcmask 195584  }
 0x1d6   : > { %v641_v40 = vsub.s32 %v638_v38, %v2168_v39  ;;  %v869_v49 = vrot.slane %v512_v41, %v852_v43  ;;  %v862_v53 = vrot.slane %v512_v41, %v660_v48  ;;  %v846_v63 = vrot.slane %v511_v59, %v660_v48  ;;  %1679 = vset.pattern.permute.xlu0 %v1910_v18  ;;  %v900_v23 = vld [vmem:[#allocation3 + $0x18] sm:$0xff] }
 0x1d7   : > { %v853_v1 = vrot.slane %v511_v59, %v852_v43 }
 0x1d8   : > { %1587 = vmatpush1.bf16.msra.mxu0 %v1586_v31  ;;  %v642_v42 = vrot.slane %v512_v41, %v641_v40  ;;  %v1068_v3 = vrot.slane %v511_v59, %v641_v40 }
 0x1d9   : > { %1597 = vmatprep.subr.bf16.mxu0 %v1906_v34 }
 0x1da   : > { %v643_v46 = vcombine.high %v642_v42, %v642_v42  ;;  %v650_v47 = vrot.slane %v642_v42, %v641_v40  ;;  %v1076_v4 = vrot.slane %v1068_v3, %v641_v40  ;;  %v1069_v5 = vcombine.high %v1068_v3, %v1068_v3  ;;  %v672_v42 = vld [vmem:[#allocation2] sm:$0xff] }
 0x1db   : > { %1470 = vmatmul.mubr.msk.f32.vlgmr.msra.gmra.mrb[0].mxu0 %vm525_vm2, %v2154_v32 }
 0x1dc   : > { %602 = vmatprep.mubr.f32.mxu0 %v1905_v26  ;;  %v657_v52 = vrot.slane %v643_v46, %v641_v40  ;;  %v661_v54 = vrot.slane %v650_v47, %v660_v48  ;;  %v1087_v6 = vrot.slane %v1076_v4, %v660_v48  ;;  %v1083_v7 = vrot.slane %v1069_v5, %v641_v40  ;;  %v673_v46 = vld [vmem:[#allocation2 + $0x8] sm:$0xff]  ;;  %v515_v4 = vld [vmem:[#allocation6] sm:$0xff] }
 0x1de   : > { %vm666_vm5 = vcmp.eq.s32.totalorder %v661_v54, %v2168_v39  ;;  %v665_v57 = vrot.slane %v657_v52, %v660_v48  ;;  %vm1092_vm8 = vcmp.eq.s32.totalorder %v1087_v6, %v2168_v39  ;;  %v1091_v8 = vrot.slane %v1083_v7, %v660_v48  ;;  %v516_v6 = vld [vmem:[#allocation6 + $0x8] sm:$0xff] }
 0x1df   : > { %1471 = vmatmul.mubr.msk.f32.gmra.mrb[2].mxu0 %vm525_vm2, %v2159_v33  ;;  %v1472_v60 = vsel %vm666_vm5, 1.0, %v1905_v26  ;;  %v2195_v9 = vsel %vm1092_vm8, 1.0, %v1905_v26  ;;  %vm1279_vm8 = vcmp.gt.s32.totalorder %v842_v28, 0 }
 0x1e0   : > { %1559 = vmatprep.mubr.msk.f32.mxu0 %vm1907_vm3, %v1905_v26  ;;  %vm667_vm7 = vcmp.eq.s32.totalorder %v665_v57, %v2168_v39  ;;  %v1271_v10 = vsel %vm1110_vm9, %v2195_v9, 0.0  ;;  %vm1093_vm10 = vcmp.eq.s32.totalorder %v1091_v8, %v2168_v39 }
 0x1e1   : > { %v1473_v2 = vsel %vm667_vm7, 1.0, %v1905_v26  ;;  %v2201_v11 = vsel %vm1093_vm10, 1.0, %v1905_v26 }
 0x1e2   : > { %v1274_v12 = vsel %vm1110_vm9, %v2201_v11, 0.0 }
 0x2ae   : > { %v598_v44 = vpop.f32.mrb[0].mxu0 }
 0x2af   : > { %610 = vst.msk [vmem:[#allocation4] sm:$0xff] %vm609_vm4, %v598_v44  ;;  %616 = vrot.lane.b32.xlu0 %v598_v44, %s1909_s11  ;;  %v600_v45 = vpop.f32.mrb[1].mxu0 }
 0x2b0   : > { %612 = vst.msk [vmem:[#allocation4 + $0x8] sm:$0xff] %vm609_vm4, %v600_v45  ;;  %626 = vrot.lane.b32.xlu1 %v600_v45, %s1909_s11 }
 0x2b2   : > { %v604_v50 = vpop.f32.mrb[2].mxu0 }
 0x2b3   : > { %611 = vst.msk [vmem:[#allocation4 + $0x10] sm:$0xff] %vm609_vm4, %v604_v50  ;;  %618 = vrot.lane.b32.xlu0 %v604_v50, %s1909_s11  ;;  %v606_v51 = vpop.f32.mrb[3].mxu0 }
 0x2b4   : > { %613 = vst.msk [vmem:[#allocation4 + $0x18] sm:$0xff] %vm609_vm4, %v606_v51  ;;  %871 = vbcast.lane.b32.xlu1 %v869_v49, 256 }
 0x2b6   : > { %v674_v55 = vld [vmem:[#allocation4] sm:$0xff] }
 0x2b7   : > { %864 = vbcast.lane.b32.xlu0 %v862_v53, 256  ;;  %v675_v56 = vld [vmem:[#allocation4 + $0x8] sm:$0xff] }
 0x2b8   : > { %628 = vrot.lane.b32.xlu1 %v606_v51, %s1909_s11  ;;  %v1589_v58 = vpack.c.bf16 %v675_v56, %v674_v55  ;;  %v1280_v51 = vsel %vm1279_vm8, 1, %v1910_v18 }
 0x2ba   : > { %1590 = vmatpush3.bf16.msra.mxu1 %v1589_v58  ;;  %v676_v61 = vld [vmem:[#allocation4 + $0x10] sm:$0xff] }
 0x2bb   : > { %881 = vbcast.lane.b32.xlu0 %v862_v53, 264  ;;  %1591 = vmatprep.subr.bf16.mxu1 %v1906_v34  ;;  %v677_v62 = vld [vmem:[#allocation4 + $0x18] sm:$0xff] }
 0x2bc   : > { %885 = vbcast.lane.b32.xlu1 %v869_v49, 264  ;;  %v1592_v0 = vpack.c.bf16 %v677_v62, %v676_v61 }
 0x2bd   : > { %1535 = vmatmul.mubr.msk.f32.vlgmr.msra.gmra.mrb[0].mxu1 %vm678_vm6, %v1472_v60 }
 0x2be   : > { %1593 = vmatpush3.bf16.msra.mxu1 %v1592_v0  ;;  %1541 = vmatprep.mubr.msk.f32.mxu1 %vm1907_vm3, %v1905_v26 }
 0x2bf   : > { %848 = vbcast.lane.b32.xlu0 %v846_v63, 256  ;;  %1594 = vmatprep.subr.bf16.mxu1 %v1906_v34 }
 0x2c0   : > { %855 = vbcast.lane.b32.xlu1 %v853_v1, 256 }
 0x2c1   : > { %1542 = vmatmul.mubr.msk.f32.vlgmr.msra.gmra.mrb[2].mxu1 %vm678_vm6, %v1473_v2 }
 0x2c2   : > { %1550 = vmatprep.mubr.msk.f32.mxu1 %vm1907_vm3, %v1905_v26 }
 0x2de   : > { %1272 = vadd.xlane.f32.xlu0 %v1271_v10 }
 0x2e4   : > { %1275 = vadd.xlane.f32.xlu1 %v1274_v12 }
 0x321   : > { %v617_v13 = vpop.permute.xlu0 %616 }
 0x322   : > { %622 = vst.msk [vmem:[#allocation3 + $0x8] sm:$0xff] %vm525_vm2, %v617_v13  ;;  %v627_v14 = vpop.permute.xlu1 %626 }
 0x323   : > { %632 = vst.msk [vmem:[#allocation3 + $0x10] sm:$0xff] %vm525_vm2, %v627_v14 }
 0x325   : > { %v619_v15 = vpop.permute.xlu0 %618 }
 0x326   : > { %623 = vst.msk [vmem:[#allocation3 + $0x20] sm:$0xff] %vm525_vm2, %v619_v15  ;;  %v872_v16 = vpop.permute.xlu1 %871 }
 0x327   : > { %v874_v36 = vadd.s32 8, %v872_v16 }
 0x329   : > { %v865_v19 = vpop.permute.xlu0 %864  ;;  %v898_v20 = vld [vmem:[#allocation3 + $0x8] sm:$0xff]  ;;  %vm876_vm5 = vcmp.eq.s32.totalorder %v842_v28, %v874_v36 }
 0x32a   : > { %v629_v21 = vpop.permute.xlu1 %628  ;;  %v1595_v22 = vpack.c.bf16 %v898_v20, %v897_v17  ;;  %v873_v27 = vadd.s32 8, %v865_v19  ;;  %v899_v35 = vld [vmem:[#allocation3 + $0x10] sm:$0xff] }
 0x32b   : > { %633 = vst.msk [vmem:[#allocation3 + $0x28] sm:$0xff] %vm525_vm2, %v629_v21 }
 0x32c   : > { %1596 = vmatpush3.bf16.msra.mxu1 %v1595_v22  ;;  %vm875_vm11 = vcmp.eq.s32.totalorder %v842_v28, %v873_v27 }
 0x32d   : > { %v882_v24 = vpop.permute.xlu0 %881  ;;  %1548 = vmatprep.subr.mxu1 %v1905_v26  ;;  %v901_v25 = vld [vmem:[#allocation3 + $0x20] sm:$0xff] }
 0x32e   : > { %v886_v29 = vpop.permute.xlu1 %885  ;;  %v1598_v30 = vpack.c.bf16 %v901_v25, %v900_v23  ;;  %v887_v31 = vadd.s32 16, %v882_v24 }
 0x32f   : > { %v888_v34 = vadd.s32 16, %v886_v29 }
 0x330   : > { %1549 = vmatpush3.msra.mxu1 %v899_v35  ;;  %1599 = vmatpush3.bf16.msra.mxu0 %v1598_v30  ;;  %vm889_vm13 = vcmp.eq.s32.totalorder %v842_v28, %v887_v31 }
 0x331   : > { %v849_v38 = vpop.permute.xlu0 %848  ;;  %1557 = vmatprep.subr.mxu0 %v1905_v26  ;;  %1562 = vmatprep.subr.mxu1 %v1905_v26  ;;  %vm890_vm14 = vcmp.eq.s32.totalorder %v842_v28, %v888_v34 }
 0x332   : > { %vm857_vm12 = vcmp.eq.s32.totalorder %v842_v28, %v849_v38  ;;  %v856_v39 = vpop.permute.xlu1 %855  ;;  %v902_v40 = vld [vmem:[#allocation3 + $0x28] sm:$0xff] }
 0x333   : > { %vm877_vm15 = vmor %vm857_vm12, %vm875_vm11  ;;  %vm858_vm0 = vcmp.eq.s32.totalorder %v842_v28, %v856_v39 }
 0x334   : > { %vm891_vm4 = vmor %vm877_vm15, %vm889_vm13  ;;  %1558 = vmatpush3.msra.mxu0 %v902_v40 }
 0x335   : > { %v1478_v37 = vsel %vm891_vm4, 1.0, %v1905_v26  ;;  %vm878_vm6 = vmor %vm858_vm0, %vm876_vm5  ;;  %1567 = vmatprep.subr.mxu0 %v1905_v26 }
 0x336   : > { %vm892_vm7 = vmor %vm878_vm6, %vm890_vm14  ;;  %1551 = vmatmul.mubr.msk.f32.vlgmr.msra.gmra.mrb[4].mxu1 %vm903_vm1, %v1478_v37 }
 0x337   : > { %v1479_v41 = vsel %vm892_vm7, 1.0, %v1905_v26  ;;  %1564 = vmatprep.mubr.msk.f32.mxu1 %vm1907_vm3, %v1905_v26 }
 0x338   : > { %1560 = vmatmul.mubr.msk.f32.vlgmr.msra.gmra.mrb[4].mxu0 %vm903_vm1, %v1479_v41 }
 0x339   : > { %1569 = vmatprep.mubr.msk.f32.mxu0 %vm1907_vm3, %v1905_v26 }
 0x36b   : > { %v1273_v55 = vpop.xlane.xlu0 %1272 }
 0x36c   : > { %vm1277_vm3 = vcmp.gt.f32.partialorder %v1273_v55, 0.0 }
 0x371   : > { %v1276_v60 = vpop.xlane.xlu1 %1275 }
 0x372   : > { %vm1278_vm10 = vcmp.gt.f32.partialorder %v1276_v60, 0.0 }
 0x390   : > { %v748_v43 = vpop.f32.mrb[0].mxu1 }
 0x391   : > { %v825_v44 = vadd.f32 %v748_v43, %v672_v42  ;;  %v1536_v45 = vpop.f32.mrb[1].mxu1 }
 0x393   : > { %1680 = vtanh.f32 %v825_v44  ;;  %v1476_v12 = vmul.f32 -1.442695, %v825_v44 }
 0x394   : > { %v821_v47 = vpop.f32.mrb[2].mxu1 }
 0x395   : > { %v826_v48 = vadd.f32 %v821_v47, %v673_v46  ;;  %v1543_v49 = vpop.f32.mrb[3].mxu1 }
 0x397   : > { %1682 = vtanh.f32 %v826_v48  ;;  %v1477_v13 = vmul.f32 -1.442695, %v826_v48 }
 0x39d   : > { %v1681_v50 = vpop.eup %1680 }
 0x39e   : > { %1102 = vrot.lane.b32.xlu0 %v1681_v50, %s1911_s16 }
 0x3a1   : > { %v1683_v52 = vpop.eup %1682 }
 0x3a2   : > { %1104 = vrot.lane.b32.xlu1 %v1683_v52, %s1911_s16  ;;  %1282 = vbcast.lane.b32.xlu0 %v1280_v51, 256 }
 0x409   : > { %v973_v26 = vpop.f32.mrb[4].mxu1 }
 0x40a   : > { %v1482_v53 = vmul.f32 -1.442695, %v973_v26  ;;  %v1552_v54 = vpop.f32.mrb[5].mxu1 }
 0x40b   : > { %v1046_v56 = vpop.f32.mrb[4].mxu0 }
 0x40c   : > { %1684 = vpow2.f32 %v1482_v53  ;;  %v1483_v57 = vmul.f32 -1.442695, %v1046_v56  ;;  %v1561_v58 = vpop.f32.mrb[5].mxu0 }
 0x40e   : > { %1686 = vpow2.f32 %v1483_v57 }
 0x410   : > { %v1103_v59 = vpop.permute.xlu0 %1102 }
 0x414   : > { %v1283_v61 = vpop.permute.xlu0 %1282  ;;  %v1105_v17 = vpop.permute.xlu1 %1104 }
 0x415   : > { %vm1284_vm11 = vcmp.ne.s32.totalorder %v1283_v61, 0 }
 0x416   : > { %v1685_v62 = vpop.eup %1684  ;;  %vm1285_vm12 = vmand %vm1277_vm3, %vm1284_vm11 }
 0x417   : > { %v1056_v63 = vadd.f32 1.0, %v1685_v62  ;;  %vm1286_vm13 = vmand %vm1278_vm10, %vm1284_vm11  ;;  %v1287_v0 = vsel %vm1285_vm12, 1, %v1910_v18 }
 0x418   : > { %v1687_v1 = vpop.eup %1686  ;;  %1290 = vperm.xlu1 %1678, %v1287_v0   ;;  %v1288_v2 = vsel %vm1286_vm13, 1, %v1910_v18 }
 0x419   : > { %1688 = vrcp.f32 %v1056_v63  ;;  %v1057_v3 = vadd.f32 1.0, %v1687_v1  ;;  %1293 = vperm.xlu0 %1679, %v1288_v2  }
 0x41b   : > { %1690 = vrcp.f32 %v1057_v3 }
 0x41c   : > { %1692 = vpow2.f32 %v1476_v12 }
 0x41d   : > { %1297 = vrot.lane.b32.xlu0 %v2154_v32, %s1909_s11  ;;  %1694 = vpow2.f32 %v1477_v13 }
 0x423   : > { %v1689_v5 = vpop.eup %1688 }
 0x424   : > { %v1098_v7 = vmul.f32 %v1689_v5, %v515_v4 }
 0x425   : > { %v1691_v8 = vpop.eup %1690 }
 0x426   : > { %1563 = vmatpush3.msra.mxu1 %v1098_v7  ;;  %v1099_v10 = vmul.f32 %v1691_v8, %v516_v6  ;;  %v1693_v14 = vpop.eup %1692 }
 0x427   : > { %1565 = vmatmul.mubr.msk.f32.vlgmr.msra.gmra.mrb[6].mxu1 %vm1110_vm9, %v2195_v9  ;;  %v1695_v32 = vpop.eup %1694  ;;  %v833_v15 = vadd.f32 1.0, %v1693_v14 }
 0x428   : > { %1568 = vmatpush3.msra.mxu0 %v1099_v10  ;;  %v834_v16 = vadd.f32 1.0, %v1695_v32 }
 0x429   : > { %1570 = vmatmul.mubr.msk.f32.vlgmr.msra.gmra.mrb[6].mxu0 %vm1110_vm9, %v2201_v11  ;;  %1696 = vrcp.f32 %v833_v15 }
 0x42a   : > { %1698 = vrcp.f32 %v834_v16 }
 0x433   : > { %v1697_v18 = vpop.eup %1696 }
 0x434   : > { %v1699_v20 = vpop.eup %1698  ;;  %v1108_v21 = vmul.f32 %v1697_v18, %v1103_v59 }
 0x435   : > { %v1109_v23 = vmul.f32 %v1699_v20, %v1105_v17 }
 0x497   : > { %v1291_v19 = vpop.permute.xlu1 %1290 }
 0x498   : > { %v1294_v9 = vpop.permute.xlu0 %1293  ;;  %vm1295_vm14 = vcmp.eq.s32.totalorder %v1291_v19, 1 }
 0x499   : > { %vm1296_vm9 = vcmp.eq.s32.totalorder %v1294_v9, 1 }
 0x49c   : > { %v1298_v36 = vpop.permute.xlu0 %1297 }
 0x4fa   : > { %v1180_v22 = vpop.f32.mrb[6].mxu1 }
 0x4fb   : > { %v1257_v11 = vadd.f32 %v1180_v22, %v1108_v21  ;;  %v1566_v24 = vpop.f32.mrb[7].mxu1 }
 0x4fc   : > { %v1253_v25 = vpop.f32.mrb[6].mxu0 }
 0x4fd   : > { %1700 = vtanh.f32 %v1257_v11  ;;  %v1258_v27 = vadd.f32 %v1253_v25, %v1109_v23  ;;  %v1305_v28 = vsel %vm1295_vm14, %v1257_v11, %v515_v4  ;;  %v1571_v29 = vpop.f32.mrb[7].mxu0 }
 0x4fe   : > { %1317 = vst.msk [vmem:[#allocation6] sm:$0xff] %vm525_vm2, %v1305_v28  ;;  %1325 = vst.msk [vmem:[#allocation16] sm:$0xff] (!%p1488_p9), %vm525_vm2, %v1305_v28 }
 0x4ff   : > { %v1306_v30 = vsel %vm1296_vm9, %v1258_v27, %v516_v6  ;;  %1702 = vtanh.f32 %v1258_v27 }
 0x500   : > { %1318 = vst.msk [vmem:[#allocation6 + $0x8] sm:$0xff] %vm525_vm2, %v1306_v30  ;;  %1326 = vst.msk [vmem:[#allocation16 + $0x8] sm:$0xff] (!%p1488_p9), %vm525_vm2, %v1306_v30 }
 0x507   : > { %v1701_v31 = vpop.eup %1700 }
 0x508   : > { %1263 = vrot.lane.b32.xlu1 %v1701_v31, %s1909_s11 }
 0x509   : > { %v1703_v34 = vpop.eup %1702 }
 0x50c   : > { %1265 = vrot.lane.b32.xlu1 %v1703_v34, %s1909_s11 }
 0x510   : > { %1299 = vrot.lane.b32.xlu1 %v2159_v33, %s1909_s11 }
 0x57a   : > { %v1264_v35 = vpop.permute.xlu1 %1263 }
 0x57b   : > { %v1269_v38 = vmul.f32 %v1697_v18, %v1264_v35 }
 0x57d   : > { %v1303_v39 = vsel %vm1295_vm14, %v1269_v38, %v1298_v36 }
 0x57e   : > { %1309 = vrot.lane.b32.xlu0 %v1303_v39, %s1912_s20  ;;  %v1266_v40 = vpop.permute.xlu1 %1265 }
 0x57f   : > { %v1270_v37 = vmul.f32 %v1699_v20, %v1266_v40 }
 0x582   : > { %v1300_v41 = vpop.permute.xlu1 %1299 }
 0x583   : > { %v1304_v42 = vsel %vm1296_vm9, %v1270_v37, %v1300_v41 }
 0x584   : > { %1311 = vrot.lane.b32.xlu1 %v1304_v42, %s1912_s20 }
 0x5f0   : > { %v1310_v43 = vpop.permute.xlu0 %1309 }
 0x5f1   : > { %1315 = vst.msk [vmem:[#allocation5] sm:$0xff] %vm525_vm2, %v1310_v43  ;;  %1322 = sbr.rel (%p1488_p9) target bundleno = 1528 (0x5f8), region = 76  ;;  %1323 = vst.msk [vmem:[#allocation15] sm:$0xff] (!%p1488_p9), %vm525_vm2, %v1310_v43 }
 0x5f6   : > { %v1312_v44 = vpop.permute.xlu1 %1311 }
 0x5f7   : > { %1316 = vst.msk [vmem:[#allocation5 + $0x8] sm:$0xff] %vm525_vm2, %v1312_v44  ;;  %1324 = vst.msk [vmem:[#allocation15 + $0x8] sm:$0xff] (!%p1488_p9), %vm525_vm2, %v1312_v44 }
 0x5f8 PF: > { %p1645_p2 = scmp.eq.s32.totalorder %s1973_s10, 3  ;;  %s1913_s26 = smov [#allocation15]  }
 0x5f9   : > { %s1333_s15 = sshll.u32 %s1913_s26, 4  ;;  %s1334_s15 = int_to_ptr.vmem [resolvable:$true] %s1333_s15 }
 0x5fa   : > { %s1816_s28 = scalar_lea.vmem %s1334_s15, 256  ;;  %p1823_p13 = scmp.lt.s32.totalorder %s1334_s15, %s1334_s15 }
 0x5fb   : > { %p1817_p10 = scmp.ne.s32.totalorder %s1334_s15, %s1816_s28  ;;  %p1824_p0 = scmp.lt.s32.totalorder %s1816_s28, %s1816_s28 }
 0x5fd   : > { %p1818_p11 = pnand %p1817_p10, %p1645_p2  ;;  %p1825_p8 = por %p1824_p0, %p1823_p13 }
 0x5ff   : > { %p1819_p12 = pneg %p1818_p11 }
 0x601   : > { %p1826_p3 = pnand %p1825_p8, %p1819_p12 }
 0x603   : > { %1829 = shalt.err (!%p1826_p3)
}
 0x604   : > { %s1830_s17 = scalar_lea.hbm %s2304_s8, 256 }
 0x605   : > { %p1831_p4 = scmp.ne.s32.totalorder %s2304_s8, %s1830_s17  ;;  %p1836_p5 = scmp.lt.u32.totalorder %s1830_s17, %s2304_s8 }
 0x607   : > { %p1832_p1 = pnand %p1831_p4, %p1645_p2 }
 0x609   : > { %p1833_p6 = pneg %p1832_p1 }
 0x60b   : > { %p1838_p7 = pnand %p1836_p5, %p1833_p6 }
 0x60d   : > { %1841 = shalt.err (!%p1838_p7)
}
 0x60e   : > { %s1914_s24 = smov 128   ;;  %s1915_s25 = smov 8  }
 0x60f   : > { %1617 = dma.vmem_to_hbm [thread:$0]  (%p1645_p2), %s1334_s15, 256, %s2304_s8, [#allocation9], %s1914_s24, %s1914_s24, %s1915_s25  }
 0x610   : > { %s1916_s14 = smov [#allocation16]  }
 0x611   : > { %s1346_s27 = sshll.u32 %s1916_s14, 4  ;;  %s1347_s27 = int_to_ptr.vmem [resolvable:$true] %s1346_s27 }
 0x612   : > { %s1842_s11 = scalar_lea.vmem %s1347_s27, 256  ;;  %p1849_p12 = scmp.lt.s32.totalorder %s1347_s27, %s1347_s27 }
 0x613   : > { %p1843_p9 = scmp.ne.s32.totalorder %s1347_s27, %s1842_s11  ;;  %p1850_p13 = scmp.lt.s32.totalorder %s1842_s11, %s1842_s11 }
 0x615   : > { %p1844_p10 = pnand %p1843_p9, %p1645_p2  ;;  %p1851_p0 = por %p1850_p13, %p1849_p12 }
 0x617   : > { %p1845_p11 = pneg %p1844_p10 }
 0x619   : > { %p1852_p8 = pnand %p1851_p0, %p1845_p11 }
 0x61b   : > { %1855 = shalt.err (!%p1852_p8)
}
 0x61c   : > { %s1856_s26 = scalar_lea.hbm %s2305_s9, 256 }
 0x61d   : > { %p1857_p3 = scmp.ne.s32.totalorder %s2305_s9, %s1856_s26  ;;  %p1862_p6 = scmp.lt.u32.totalorder %s1856_s26, %s2305_s9 }
 0x61f   : > { %p1858_p4 = pnand %p1857_p3, %p1645_p2 }
 0x621   : > { %p1859_p1 = pneg %p1858_p4 }
 0x623   : > { %p1864_p5 = pnand %p1862_p6, %p1859_p1 }
 0x625   : > { %1867 = shalt.err (!%p1864_p5)
}
 0x626   : > { %1619 = dma.vmem_to_hbm [thread:$0]  (%p1645_p2), %s1347_s27, 256, %s2305_s9, [#allocation17], %s1914_s24, %s1914_s24, %s1915_s25  }
 0x627   : > { %1885 = dma.done.wait (%p1645_p2), [#allocation9], 256  }
 0x628   : > { %1887 = vsyncadd (%p1645_p2), [#allocation9], 4294967040 }
 0x629   : > { %1889 = dma.done.wait (%p1645_p2), [#allocation17], 256  }
 0x62a   : > { %1891 = vsyncadd (%p1645_p2), [#allocation17], 4294967040 }
 0x62b PF: > { %s25_s30 = sadd.s32 1, %s1894_s30  }
 0x62c   : > { %p22_p7 = scmp.ge.s32.totalorder %s25_s30, 6  }
 0x62e   :  { %24 = sbr.rel (!%p22_p7) target bundleno = 5 (0x5), region = 115 }
 0x635   :  { %1366 = vsyncpa [#allocation8], 1 }
 0x636   :  { %1368 = vsyncpa [#allocation8 + $0x1], 1 }
 0x637   :  { %1369 = vsyncpa [#allocation11], 1 }
 0x638   :  { %1370 = vsyncpa [#allocation14], 1 }
 0x639   :  { %1371 = vsyncpa [#allocation9], 1 }
 0x63a   :  { %1373 = vsyncpa [#allocation9 + $0x1], 1 }
 0x63b   :  { %1374 = vsyncpa [#allocation17], 1 }

</bundles_post_ra>
